<compile_context>
chip_gen: v5e
topology: v5e:2x2
jax: 0.10.0
libtpu: 0.0.40
codegen_flags: <defaults>
</compile_context>

<pallas_src>
import jax
import jax.numpy as jnp
from jax.experimental import pallas as pl
from jax.experimental.pallas import tpu as pltpu

IN_FEATURES = 28 * 28
HIDDEN = 8
OUT_FEATURES = 10
OUT_PAD = 128  # lane-dense padded output width


def _mlp_kernel(x_ref,
                w1_ref, b1_ref,
                w2_ref, b2_ref,
                w3_ref, b3_ref,
                w4_ref, b4_ref,
                o_ref):
    # x_ref: (TILE_N, 784) bf16; w1: (784, 8) bf16; w2, w3: (8, 8) f32;
    # w4: (8, 128) f32 (zero past column 10); biases broadcast as (1, out).
    x = x_ref[...]

    h = jnp.dot(x, w1_ref[...], preferred_element_type=jnp.float32) + b1_ref[...]
    h = jnp.maximum(h, 0.0)

    h = jnp.dot(h, w2_ref[...], preferred_element_type=jnp.float32) + b2_ref[...]
    h = jnp.maximum(h, 0.0)

    h = jnp.dot(h, w3_ref[...], preferred_element_type=jnp.float32) + b3_ref[...]
    h = jnp.maximum(h, 0.0)

    out = jnp.dot(h, w4_ref[...], preferred_element_type=jnp.float32) + b4_ref[...]
    o_ref[...] = out.astype(o_ref.dtype)


def _round_up(x, m):
    return ((x + m - 1) // m) * m


def _pick_tile_and_vmem_limit():
    """Generation-aware batch tile (rows) and optional scoped-VMEM bump."""
    try:
        kind = jax.devices()[0].device_kind.lower()
    except Exception:  # defensive: fall back to the safe-everywhere choice
        kind = ""
    if "v6" in kind:
        # 8192x784xbf16 double-buffered + 8192x128xf32 output ~= 33 MiB;
        # above the 32 MiB default scoped limit, well inside 128 MiB physical.
        return 8192, 100 << 20
    # Safe everywhere: ~8.4 MiB of double-buffered tiles fits v5e's 16 MiB
    # default scoped VMEM and leaves ample headroom on v7x's 64 MiB VMEM.
    return 2048, None


def simple_dnn_forward(x_nchw, params):
    """x_nchw: (N, 1, 28, 28) float32.  params: dict of weights/biases."""
    n = x_nchw.shape[0]
    # == torch x.view(-1, 784); cast to bf16 to halve the dominant HBM read.
    x = x_nchw.reshape(n, IN_FEATURES).astype(jnp.bfloat16)

    max_tile, vmem_limit = _pick_tile_and_vmem_limit()
    tile_n = min(max_tile, _round_up(max(n, 1), 16))   # bf16 sublane multiple
    padded_n = _round_up(n, tile_n)
    if padded_n != n:
        x = jnp.pad(x, ((0, padded_n - n), (0, 0)))

    # First (and only large) matmul runs on the native bf16 MXU path.
    w1 = params["w1"].astype(jnp.bfloat16)
    b1 = params["b1"].reshape(1, -1).astype(jnp.float32)
    w2 = params["w2"].astype(jnp.float32)
    b2 = params["b2"].reshape(1, -1).astype(jnp.float32)
    w3 = params["w3"].astype(jnp.float32)
    b3 = params["b3"].reshape(1, -1).astype(jnp.float32)
    # Pad the last layer to 128 output lanes -> unmasked, lane-dense stores.
    w4 = jnp.zeros((HIDDEN, OUT_PAD), jnp.float32).at[:, :OUT_FEATURES].set(
        params["w4"].astype(jnp.float32))
    b4 = jnp.zeros((1, OUT_PAD), jnp.float32).at[:, :OUT_FEATURES].set(
        params["b4"].astype(jnp.float32))

    def resident(a):
        # Same block every grid step -> stays in VMEM, no per-tile re-DMA.
        return pl.BlockSpec(a.shape, lambda i: (0,) * a.ndim)

    grid = (pl.cdiv(padded_n, tile_n),)

    cp_kwargs = dict(dimension_semantics=("parallel",))
    if vmem_limit is not None:
        cp_kwargs["vmem_limit_bytes"] = vmem_limit

    out = pl.pallas_call(
        _mlp_kernel,
        out_shape=jax.ShapeDtypeStruct((padded_n, OUT_PAD), jnp.float32),
        grid=grid,
        in_specs=[
            pl.BlockSpec((tile_n, IN_FEATURES), lambda i: (i, 0)),
            resident(w1), resident(b1),
            resident(w2), resident(b2),
            resident(w3), resident(b3),
            resident(w4), resident(b4),
        ],
        out_specs=pl.BlockSpec((tile_n, OUT_PAD), lambda i: (i, 0)),
        compiler_params=pltpu.CompilerParams(**cp_kwargs),
    )(x, w1, b1, w2, b2, w3, b3, w4, b4)

    return out[:n, :OUT_FEATURES]


def init_params(key):
    """Deterministic init matching the shapes of SimpleDNN.__init__."""
    dims = [(IN_FEATURES, HIDDEN), (HIDDEN, HIDDEN), (HIDDEN, HIDDEN),
            (HIDDEN, OUT_FEATURES)]
    params = {}
    for i, (fan_in, fan_out) in enumerate(dims, start=1):
        key, kw, kb = jax.random.split(key, 3)
        bound = 1.0 / jnp.sqrt(fan_in)
        # Stored as (in, out): already transposed relative to torch's (out, in).
        params[f"w{i}"] = jax.random.uniform(
            kw, (fan_in, fan_out), jnp.float32, -bound, bound)
        params[f"b{i}"] = jax.random.uniform(
            kb, (fan_out,), jnp.float32, -bound, bound)
    return params


def reference_forward(x_nchw, params, match_kernel_precision=False):
    """Pure-JAX reference.  With match_kernel_precision=True, mirrors the
    kernel's bf16 cast of x / w1 (still f32 accumulate)."""
    x = x_nchw.reshape(x_nchw.shape[0], IN_FEATURES)
    w1 = params["w1"]
    if match_kernel_precision:
        x = x.astype(jnp.bfloat16)
        w1 = w1.astype(jnp.bfloat16)
    h = jnp.maximum(
        jnp.dot(x, w1, preferred_element_type=jnp.float32) + params["b1"], 0.0)
    h = jnp.maximum(h @ params["w2"] + params["b2"], 0.0)
    h = jnp.maximum(h @ params["w3"] + params["b3"], 0.0)
    return h @ params["w4"] + params["b4"]


if __name__ == "__main__":
    key = jax.random.PRNGKey(0)
    key, kx = jax.random.split(key)

    batch = 8
    x = jax.random.normal(kx, (batch, 1, 28, 28), jnp.float32)  # NCHW like torch
    params = init_params(key)

    out = jax.block_until_ready(simple_dnn_forward(x, params))
    assert out.shape == (batch, OUT_FEATURES), out.shape

    ref_matched = reference_forward(x, params, match_kernel_precision=True)
    ref_f32 = reference_forward(x, params, match_kernel_precision=False)
    assert jnp.allclose(out, ref_matched, atol=1e-2, rtol=1e-2), (
        "mismatch vs precision-matched reference")
    assert jnp.allclose(out, ref_f32, atol=5e-2, rtol=5e-2), (
        "mismatch vs f32 reference")

    print("KERNEL_OK")
</pallas_src>

<mosaic_0001>
module attributes {stable_mosaic.version = 11 : i64} {
  func.func @_mlp_kernel(%arg0: i32, %arg1: memref<16x784xbf16, #tpu.memory_space<vmem>>, %arg2: memref<784x8xbf16, #tpu.memory_space<vmem>>, %arg3: memref<1x8xf32, #tpu.memory_space<vmem>>, %arg4: memref<8x8xf32, #tpu.memory_space<vmem>>, %arg5: memref<1x8xf32, #tpu.memory_space<vmem>>, %arg6: memref<8x8xf32, #tpu.memory_space<vmem>>, %arg7: memref<1x8xf32, #tpu.memory_space<vmem>>, %arg8: memref<8x128xf32, #tpu.memory_space<vmem>>, %arg9: memref<1x128xf32, #tpu.memory_space<vmem>>, %arg10: memref<16x128xf32, #tpu.memory_space<vmem>>) attributes {dimension_semantics = [#tpu.dimension_semantics<parallel>], iteration_bounds = array<i64: 1>, scalar_prefetch = 0 : i64, scratch_operands = 0 : i64, tpu.core_type = #tpu.core_type<tc>, window_params = [{transform_indices = @transform_0, window_bounds = array<i64: 16, 784>}, {pipeline_mode = #tpu.pipeline_mode<synchronous>, transform_indices = @transform_1, window_bounds = array<i64: 784, 8>}, {pipeline_mode = #tpu.pipeline_mode<synchronous>, transform_indices = @transform_2, window_bounds = array<i64: 1, 8>}, {pipeline_mode = #tpu.pipeline_mode<synchronous>, transform_indices = @transform_3, window_bounds = array<i64: 8, 8>}, {pipeline_mode = #tpu.pipeline_mode<synchronous>, transform_indices = @transform_4, window_bounds = array<i64: 1, 8>}, {pipeline_mode = #tpu.pipeline_mode<synchronous>, transform_indices = @transform_5, window_bounds = array<i64: 8, 8>}, {pipeline_mode = #tpu.pipeline_mode<synchronous>, transform_indices = @transform_6, window_bounds = array<i64: 1, 8>}, {pipeline_mode = #tpu.pipeline_mode<synchronous>, transform_indices = @transform_7, window_bounds = array<i64: 8, 128>}, {pipeline_mode = #tpu.pipeline_mode<synchronous>, transform_indices = @transform_8, window_bounds = array<i64: 1, 128>}, {transform_indices = @transform_9, window_bounds = array<i64: 16, 128>}]} {
    %c0 = arith.constant 0 : index
    %c0_0 = arith.constant 0 : index
    %0 = vector.load %arg1[%c0, %c0_0] : memref<16x784xbf16, #tpu.memory_space<vmem>>, vector<16x784xbf16>
    %c0_1 = arith.constant 0 : index
    %c0_2 = arith.constant 0 : index
    %1 = vector.load %arg2[%c0_1, %c0_2] : memref<784x8xbf16, #tpu.memory_space<vmem>>, vector<784x8xbf16>
    %cst = arith.constant dense<0.000000e+00> : vector<16x8xf32>
    %2 = tpu.matmul %0, %1, %cst {dimension_numbers = #tpu.dot_dimension_numbers<[1], [0], [0], [1], [0, 0, 1, 1], [], []>} : vector<16x784xbf16>, vector<784x8xbf16>, vector<16x8xf32> -> vector<16x8xf32>
    %c0_3 = arith.constant 0 : index
    %c0_4 = arith.constant 0 : index
    %3 = vector.load %arg3[%c0_3, %c0_4] : memref<1x8xf32, #tpu.memory_space<vmem>>, vector<1x8xf32>
    %4 = vector.broadcast %3 : vector<1x8xf32> to vector<16x8xf32>
    %5 = arith.addf %2, %4 : vector<16x8xf32>
    %cst_5 = arith.constant 0.000000e+00 : f32
    %6 = vector.broadcast %cst_5 : f32 to vector<16x8xf32>
    %7 = arith.maximumf %5, %6 : vector<16x8xf32>
    %c0_6 = arith.constant 0 : index
    %c0_7 = arith.constant 0 : index
    %8 = vector.load %arg4[%c0_6, %c0_7] : memref<8x8xf32, #tpu.memory_space<vmem>>, vector<8x8xf32>
    %cst_8 = arith.constant dense<0.000000e+00> : vector<16x8xf32>
    %9 = tpu.matmul %7, %8, %cst_8 {dimension_numbers = #tpu.dot_dimension_numbers<[1], [0], [0], [1], [0, 0, 1, 1], [], []>} : vector<16x8xf32>, vector<8x8xf32>, vector<16x8xf32> -> vector<16x8xf32>
    %c0_9 = arith.constant 0 : index
    %c0_10 = arith.constant 0 : index
    %10 = vector.load %arg5[%c0_9, %c0_10] : memref<1x8xf32, #tpu.memory_space<vmem>>, vector<1x8xf32>
    %11 = vector.broadcast %10 : vector<1x8xf32> to vector<16x8xf32>
    %12 = arith.addf %9, %11 : vector<16x8xf32>
    %cst_11 = arith.constant 0.000000e+00 : f32
    %13 = vector.broadcast %cst_11 : f32 to vector<16x8xf32>
    %14 = arith.maximumf %12, %13 : vector<16x8xf32>
    %c0_12 = arith.constant 0 : index
    %c0_13 = arith.constant 0 : index
    %15 = vector.load %arg6[%c0_12, %c0_13] : memref<8x8xf32, #tpu.memory_space<vmem>>, vector<8x8xf32>
    %cst_14 = arith.constant dense<0.000000e+00> : vector<16x8xf32>
    %16 = tpu.matmul %14, %15, %cst_14 {dimension_numbers = #tpu.dot_dimension_numbers<[1], [0], [0], [1], [0, 0, 1, 1], [], []>} : vector<16x8xf32>, vector<8x8xf32>, vector<16x8xf32> -> vector<16x8xf32>
    %c0_15 = arith.constant 0 : index
    %c0_16 = arith.constant 0 : index
    %17 = vector.load %arg7[%c0_15, %c0_16] : memref<1x8xf32, #tpu.memory_space<vmem>>, vector<1x8xf32>
    %18 = vector.broadcast %17 : vector<1x8xf32> to vector<16x8xf32>
    %19 = arith.addf %16, %18 : vector<16x8xf32>
    %cst_17 = arith.constant 0.000000e+00 : f32
    %20 = vector.broadcast %cst_17 : f32 to vector<16x8xf32>
    %21 = arith.maximumf %19, %20 : vector<16x8xf32>
    %c0_18 = arith.constant 0 : index
    %c0_19 = arith.constant 0 : index
    %22 = vector.load %arg8[%c0_18, %c0_19] : memref<8x128xf32, #tpu.memory_space<vmem>>, vector<8x128xf32>
    %cst_20 = arith.constant dense<0.000000e+00> : vector<16x128xf32>
    %23 = tpu.matmul %21, %22, %cst_20 {dimension_numbers = #tpu.dot_dimension_numbers<[1], [0], [0], [1], [0, 0, 1, 1], [], []>} : vector<16x8xf32>, vector<8x128xf32>, vector<16x128xf32> -> vector<16x128xf32>
    %c0_21 = arith.constant 0 : index
    %c0_22 = arith.constant 0 : index
    %24 = vector.load %arg9[%c0_21, %c0_22] : memref<1x128xf32, #tpu.memory_space<vmem>>, vector<1x128xf32>
    %25 = vector.broadcast %24 : vector<1x128xf32> to vector<16x128xf32>
    %26 = arith.addf %23, %25 : vector<16x128xf32>
    %c0_23 = arith.constant 0 : index
    %c0_24 = arith.constant 0 : index
    %27 = vector.load %arg10[%c0_23, %c0_24] : memref<16x128xf32, #tpu.memory_space<vmem>>, vector<16x128xf32>
    tpu.vector_store %arg10[%c0_23, %c0_24], %26 {strides = array<i32>} : memref<16x128xf32, #tpu.memory_space<vmem>>, vector<16x128xf32>,
    return
  }
  func.func @transform_0(%arg0: i32) -> (i32, i32) {
    %c0_i32 = arith.constant 0 : i32
    %c0_i32_0 = arith.constant 0 : i32
    return %arg0, %c0_i32 : i32, i32
  }
  func.func @transform_1(%arg0: i32) -> (i32, i32) {
    %c0_i32 = arith.constant 0 : i32
    %c0_i32_0 = arith.constant 0 : i32
    %c0_i32_1 = arith.constant 0 : i32
    return %c0_i32, %c0_i32_0 : i32, i32
  }
  func.func @transform_2(%arg0: i32) -> (i32, i32) {
    %c0_i32 = arith.constant 0 : i32
    %c0_i32_0 = arith.constant 0 : i32
    %c0_i32_1 = arith.constant 0 : i32
    return %c0_i32, %c0_i32_0 : i32, i32
  }
  func.func @transform_3(%arg0: i32) -> (i32, i32) {
    %c0_i32 = arith.constant 0 : i32
    %c0_i32_0 = arith.constant 0 : i32
    %c0_i32_1 = arith.constant 0 : i32
    return %c0_i32, %c0_i32_0 : i32, i32
  }
  func.func @transform_4(%arg0: i32) -> (i32, i32) {
    %c0_i32 = arith.constant 0 : i32
    %c0_i32_0 = arith.constant 0 : i32
    %c0_i32_1 = arith.constant 0 : i32
    return %c0_i32, %c0_i32_0 : i32, i32
  }
  func.func @transform_5(%arg0: i32) -> (i32, i32) {
    %c0_i32 = arith.constant 0 : i32
    %c0_i32_0 = arith.constant 0 : i32
    %c0_i32_1 = arith.constant 0 : i32
    return %c0_i32, %c0_i32_0 : i32, i32
  }
  func.func @transform_6(%arg0: i32) -> (i32, i32) {
    %c0_i32 = arith.constant 0 : i32
    %c0_i32_0 = arith.constant 0 : i32
    %c0_i32_1 = arith.constant 0 : i32
    return %c0_i32, %c0_i32_0 : i32, i32
  }
  func.func @transform_7(%arg0: i32) -> (i32, i32) {
    %c0_i32 = arith.constant 0 : i32
    %c0_i32_0 = arith.constant 0 : i32
    %c0_i32_1 = arith.constant 0 : i32
    return %c0_i32, %c0_i32_0 : i32, i32
  }
  func.func @transform_8(%arg0: i32) -> (i32, i32) {
    %c0_i32 = arith.constant 0 : i32
    %c0_i32_0 = arith.constant 0 : i32
    %c0_i32_1 = arith.constant 0 : i32
    return %c0_i32, %c0_i32_0 : i32, i32
  }
  func.func @transform_9(%arg0: i32) -> (i32, i32) {
    %c0_i32 = arith.constant 0 : i32
    %c0_i32_0 = arith.constant 0 : i32
    return %arg0, %c0_i32 : i32, i32
  }
}

</mosaic_0001>

<bundles_post_ra>
// kernel: tpu_custom_call.1
= control target key start
LH: loop header
LB: loop body
LE: loop exit
PB: predicated region body
PF: predicated region fallthrough
CT: control target
= control target key end

     0   :  { %s1296_s0 = inlined_call_operand.vmem [shape: bf16[16,784], index: 0, kind: input, shape index: {}]   ;;  %s1297_s1 = inlined_call_operand.vmem [shape: bf16[784,8], index: 1, kind: input, shape index: {}]   ;;  %s1298_s2 = inlined_call_operand.vmem [shape: f32[1,8], index: 2, kind: input, shape index: {}]   ;;  %s1299_s3 = inlined_call_operand.vmem [shape: f32[8,8], index: 3, kind: input, shape index: {}]   ;;  %s1300_s4 = inlined_call_operand.vmem [shape: f32[1,8], index: 4, kind: input, shape index: {}]   ;;  %s1301_s5 = inlined_call_operand.vmem [shape: f32[8,8], index: 5, kind: input, shape index: {}]   ;;  %s1302_s6 = inlined_call_operand.vmem [shape: f32[1,8], index: 6, kind: input, shape index: {}]   ;;  %s1303_s7 = inlined_call_operand.vmem [shape: f32[8,128], index: 7, kind: input, shape index: {}]   ;;  %s1304_s8 = inlined_call_operand.vmem [shape: f32[1,128], index: 8, kind: input, shape index: {}]   ;;  %s1305_s9 = inlined_call_operand.hbm [shape: f32[16,128], index: 9, kind: output, shape index: {}]  }
   0x1   :  { %v949_v0 = vld [vmem:[%s1297_s1 + $0x38] sm:$0xff]  ;;  %v948_v4 = vld [vmem:[%s1297_s1 + $0x30] sm:$0xff]  ;;  %v947_v8 = vld [vmem:[%s1297_s1 + $0x28] sm:$0xff] }
   0x2   :  { %v957_v1 = vld [vmem:[%s1297_s1 + $0x78] sm:$0xff]  ;;  %477 = vmatpush.bf16.msra.mxu0 %v949_v0  ;;  %v956_v5 = vld [vmem:[%s1297_s1 + $0x70] sm:$0xff]  ;;  %v955_v9 = vld [vmem:[%s1297_s1 + $0x68] sm:$0xff] }
   0x3   :  { %v965_v2 = vld [vmem:[%s1297_s1 + $0xb8] sm:$0xff]  ;;  %491 = vmatpush.bf16.msra.mxu1 %v957_v1  ;;  %v964_v6 = vld [vmem:[%s1297_s1 + $0xb0] sm:$0xff]  ;;  %v963_v10 = vld [vmem:[%s1297_s1 + $0xa8] sm:$0xff] }
   0x4   :  { %v973_v3 = vld [vmem:[%s1297_s1 + $0xf8] sm:$0xff]  ;;  %505 = vmatpush.bf16.msra.mxu2 %v965_v2  ;;  %v972_v7 = vld [vmem:[%s1297_s1 + $0xf0] sm:$0xff]  ;;  %v971_v11 = vld [vmem:[%s1297_s1 + $0xe8] sm:$0xff] }
   0x5   :  { %519 = vmatpush.bf16.msra.mxu3 %v973_v3  ;;  %v946_v12 = vld [vmem:[%s1297_s1 + $0x20] sm:$0xff]  ;;  %v945_v16 = vld [vmem:[%s1297_s1 + $0x18] sm:$0xff]  ;;  %v944_v20 = vld [vmem:[%s1297_s1 + $0x10] sm:$0xff] }
   0x6   :  { %478 = vmatpush.bf16.msra.mxu0 %v948_v4  ;;  %v954_v13 = vld [vmem:[%s1297_s1 + $0x60] sm:$0xff]  ;;  %v953_v17 = vld [vmem:[%s1297_s1 + $0x58] sm:$0xff]  ;;  %v952_v21 = vld [vmem:[%s1297_s1 + $0x50] sm:$0xff] }
   0x7   :  { %492 = vmatpush.bf16.msra.mxu1 %v956_v5  ;;  %v962_v14 = vld [vmem:[%s1297_s1 + $0xa0] sm:$0xff]  ;;  %v961_v18 = vld [vmem:[%s1297_s1 + $0x98] sm:$0xff]  ;;  %v960_v22 = vld [vmem:[%s1297_s1 + $0x90] sm:$0xff] }
   0x8   :  { %506 = vmatpush.bf16.msra.mxu2 %v964_v6  ;;  %v970_v15 = vld [vmem:[%s1297_s1 + $0xe0] sm:$0xff]  ;;  %v969_v19 = vld [vmem:[%s1297_s1 + $0xd8] sm:$0xff]  ;;  %v968_v23 = vld [vmem:[%s1297_s1 + $0xd0] sm:$0xff] }
   0x9   :  { %520 = vmatpush.bf16.msra.mxu3 %v972_v7 }
   0xa   :  { %479 = vmatpush.bf16.msra.mxu0 %v947_v8 }
   0xb   :  { %493 = vmatpush.bf16.msra.mxu1 %v955_v9 }
   0xc   :  { %507 = vmatpush.bf16.msra.mxu2 %v963_v10 }
   0xd   :  { %521 = vmatpush.bf16.msra.mxu3 %v971_v11 }
   0xe   :  { %480 = vmatpush.bf16.msra.mxu0 %v946_v12 }
   0xf   :  { %494 = vmatpush.bf16.msra.mxu1 %v954_v13 }
  0x10   :  { %508 = vmatpush.bf16.msra.mxu2 %v962_v14 }
  0x11   :  { %522 = vmatpush.bf16.msra.mxu3 %v970_v15 }
  0x12   :  { %481 = vmatpush.bf16.msra.mxu0 %v945_v16 }
  0x13   :  { %495 = vmatpush.bf16.msra.mxu1 %v953_v17 }
  0x14   :  { %509 = vmatpush.bf16.msra.mxu2 %v961_v18 }
  0x15   :  { %523 = vmatpush.bf16.msra.mxu3 %v969_v19 }
  0x16   :  { %14 = vsyncpa [#allocation3], 0  ;;  %482 = vmatpush.bf16.msra.mxu0 %v944_v20  ;;  %v943_v24 = vld [vmem:[%s1297_s1 + $0x8] sm:$0xff]  ;;  %v942_v28 = vld [vmem:[%s1297_s1] sm:$0xff]  ;;  %vm473_vm0 = vcmask 130048   ;;  %vm582_vm1 = vcmask 64512  }
  0x17   :  { %496 = vmatpush.bf16.msra.mxu1 %v952_v21  ;;  %v951_v25 = vld [vmem:[%s1297_s1 + $0x48] sm:$0xff]  ;;  %v950_v29 = vld [vmem:[%s1297_s1 + $0x40] sm:$0xff]  ;;  %v938_v31 = vld [vmem:[%s1296_s0 + $0x18] sm:$0xf0]  ;;  %s1024_s16 = smov [#allocation2]   ;;  %s692_s19 = sshll.u32 %s1305_s9, 4  ;;  %s693_s19 = int_to_ptr.hbm [resolvable:$true] %s692_s19 }
  0x18   :  { %510 = vmatpush.bf16.msra.mxu2 %v960_v22  ;;  %v959_v26 = vld [vmem:[%s1297_s1 + $0x88] sm:$0xff]  ;;  %v706_v30 = vld [vmem:[%s1296_s0] sm:$0xf]  ;;  %v935_v32 = vld [vmem:[%s1296_s0 + $0x4] sm:$0xf]  ;;  %s690_s17 = sshll.u32 %s1024_s16, 4  ;;  %s691_s17 = int_to_ptr.vmem [resolvable:$true] %s690_s17 }
  0x19   :  { %524 = vmatpush.bf16.msra.mxu3 %v968_v23  ;;  %v967_v27 = vld [vmem:[%s1297_s1 + $0xc8] sm:$0xff]  ;;  %v708_v33 = vld [vmem:[%s1296_s0 + $0x1c] sm:$0xf0]  ;;  %v981_v34 = vld [vmem:[%s1297_s1 + $0x138] sm:$0xff]  ;;  %v707_v40 = vor.u32 %v938_v31, %v706_v30  ;;  %s1025_s20 = smov 128   ;;  %s1026_s21 = smov 8  }
  0x1a   :  { %483 = vmatpush.bf16.msra.mxu0 %v943_v24  ;;  %v989_v35 = vld [vmem:[%s1297_s1 + $0x178] sm:$0xff]  ;;  %v958_v36 = vld [vmem:[%s1297_s1 + $0x80] sm:$0xff]  ;;  %v714_v38 = vld [vmem:[%s1296_s0 + $0x8] sm:$0xf]  ;;  %v711_v43 = vor.u32 %v935_v32, %v708_v33 }
  0x1b   :  { %497 = vmatpush.bf16.msra.mxu1 %v951_v25  ;;  %v966_v37 = vld [vmem:[%s1297_s1 + $0xc0] sm:$0xff]  ;;  %v936_v41 = vld [vmem:[%s1296_s0 + $0xc] sm:$0xf]  ;;  %v716_v42 = vld [vmem:[%s1296_s0 + $0x24] sm:$0xf0] }
  0x1c   :  { %511 = vmatpush.bf16.msra.mxu2 %v959_v26  ;;  %v939_v39 = vld [vmem:[%s1296_s0 + $0x20] sm:$0xf0]  ;;  %v980_v45 = vld [vmem:[%s1297_s1 + $0x130] sm:$0xff]  ;;  %v719_v48 = vor.u32 %v936_v41, %v716_v42  ;;  %v979_v49 = vld [vmem:[%s1297_s1 + $0x128] sm:$0xff] }
  0x1d   :  { %525 = vmatpush.bf16.msra.mxu3 %v967_v27  ;;  %v990_v44 = vld [vmem:[%s1297_s1 + $0x180] sm:$0xff]  ;;  %v988_v46 = vld [vmem:[%s1297_s1 + $0x170] sm:$0xff]  ;;  %v715_v47 = vor.u32 %v939_v39, %v714_v38  ;;  %v987_v50 = vld [vmem:[%s1297_s1 + $0x168] sm:$0xff] }
  0x1e   :  { %484 = vmatpush.bf16.msra.mxu0 %v942_v28  ;;  %v978_v51 = vld [vmem:[%s1297_s1 + $0x120] sm:$0xff]  ;;  %v977_v53 = vld [vmem:[%s1297_s1 + $0x118] sm:$0xff]  ;;  %v941_v56 = vld [vmem:[%s1296_s0 + $0x30] sm:$0xf0] }
  0x1f   :  { %498 = vmatpush.bf16.msra.mxu1 %v950_v29  ;;  %v986_v52 = vld [vmem:[%s1297_s1 + $0x160] sm:$0xff]  ;;  %v985_v54 = vld [vmem:[%s1297_s1 + $0x158] sm:$0xff]  ;;  %v976_v57 = vld [vmem:[%s1297_s1 + $0x110] sm:$0xff] }
  0x20   :  { %512 = vmatpush.bf16.msra.mxu2 %v958_v36  ;;  %v730_v55 = vld [vmem:[%s1296_s0 + $0x18] sm:$0xf]  ;;  %v984_v58 = vld [vmem:[%s1297_s1 + $0x150] sm:$0xff]  ;;  %v975_v60 = vld [vmem:[%s1297_s1 + $0x108] sm:$0xff] }
  0x21   :  { %526 = vmatpush.bf16.msra.mxu3 %v966_v37  ;;  %485 = vmatmul.bf16.vlgmr.msra.gmra.mxu0 %v707_v40  ;;  %v731_v59 = vor.u32 %v941_v56, %v730_v55  ;;  %v983_v61 = vld [vmem:[%s1297_s1 + $0x148] sm:$0xff]  ;;  %v974_v62 = vld [vmem:[%s1297_s1 + $0x100] sm:$0xff]  ;;  %v722_v0 = vld [vmem:[%s1296_s0 + $0x10] sm:$0xf] }
  0x22   :  { %533 = vmatpush.bf16.msrb.mxu0 %v981_v34  ;;  %499 = vmatmul.bf16.vlgmr.msra.gmra.mxu1 %v711_v43  ;;  %v982_v63 = vld [vmem:[%s1297_s1 + $0x140] sm:$0xff]  ;;  %v940_v1 = vld [vmem:[%s1296_s0 + $0x28] sm:$0xf0]  ;;  %v937_v2 = vld [vmem:[%s1296_s0 + $0x14] sm:$0xf] }
  0x23   :  { %547 = vmatpush.bf16.msrb.mxu1 %v989_v35  ;;  %513 = vmatmul.bf16.vlgmr.msra.gmra.mxu2 %v715_v47  ;;  %v724_v3 = vld [vmem:[%s1296_s0 + $0x2c] sm:$0xf0]  ;;  %v723_v4 = vor.u32 %v940_v1, %v722_v0  ;;  %v577_v6 = vld [vmem:[%s1299_s3] sm:$0xff] }
  0x24   :  { %568 = vmatpush.bf16.msrb.mxu2 %v990_v44  ;;  %527 = vmatmul.bf16.vlgmr.msra.gmra.mxu3 %v719_v48  ;;  %v727_v5 = vor.u32 %v937_v2, %v724_v3  ;;  %v994_v10 = vld [vmem:[%s1298_s2] ss:$0 sm:$0xff] }
  0x25   :  { %604 = vmatpush.msrb.mxu3 %v577_v6  ;;  %v614_v11 = vld [vmem:[%s1301_s5] sm:$0xff] }
  0x26   :  { %534 = vmatpush.bf16.msrb.mxu0 %v980_v45  ;;  %v650_v39 = vld [vmem:[%s1303_s7] sm:$0xff] }
  0x27   :  { %548 = vmatpush.bf16.msrb.mxu1 %v988_v46  ;;  %676 = vmatpush.msra.mxu3 %v650_v39  ;;  %v995_v40 = vld [vmem:[%s1300_s4] ss:$0 sm:$0xff] }
  0x28   :  { %640 = vmatpush.msra.mxu2 %v614_v11  ;;  %v996_v47 = vld [vmem:[%s1302_s6] ss:$0 sm:$0xff] }
  0x2a   :  { %535 = vmatpush.bf16.msrb.mxu0 %v979_v49 }
  0x2b   :  { %549 = vmatpush.bf16.msrb.mxu1 %v987_v50 }
  0x2e   :  { %536 = vmatpush.bf16.msrb.mxu0 %v978_v51 }
  0x2f   :  { %550 = vmatpush.bf16.msrb.mxu1 %v986_v52 }
  0x32   :  { %537 = vmatpush.bf16.msrb.mxu0 %v977_v53 }
  0x33   :  { %551 = vmatpush.bf16.msrb.mxu1 %v985_v54  ;;  %928 = vmatmul.msk.bf16.vlgmr.msrb.gmra.mxu2 %vm473_vm0, %v731_v59  ;;  %v997_v54 = vld [vmem:[%s1304_s8] ss:$0 sm:$0xff] }
  0x36   :  { %538 = vmatpush.bf16.msrb.mxu0 %v976_v57 }
  0x37   :  { %552 = vmatpush.bf16.msrb.mxu1 %v984_v58 }
  0x3a   :  { %539 = vmatpush.bf16.msrb.mxu0 %v975_v60 }
  0x3b   :  { %553 = vmatpush.bf16.msrb.mxu1 %v983_v61 }
  0x3e   :  { %540 = vmatpush.bf16.msrb.mxu0 %v974_v62 }
  0x3f   :  { %554 = vmatpush.bf16.msrb.mxu1 %v982_v63 }
  0x41   :  { %541 = vmatmul.bf16.vlgmr.msrb.gmra.mxu0 %v723_v4 }
  0x42   :  { %555 = vmatmul.bf16.vlgmr.msrb.gmra.mxu1 %v727_v5 }
  0x9e   :  { %v486_v7 = vpop.f32.mrf.mxu0 }
  0x9f   :  { %v500_v8 = vpop.f32.mrf.mxu1  ;;  %v487_v12 = vadd.f32 %v994_v10, %v486_v7 }
  0xa1   :  { %v501_v13 = vadd.f32 %v500_v8, %v487_v12 }
  0xa6   :  { %v514_v9 = vpop.f32.mrf.mxu2  ;;  %v488_v14 = vpop.f32.mrf.mxu0 }
  0xa7   :  { %v502_v15 = vpop.f32.mrf.mxu1  ;;  %v528_v17 = vpop.f32.mrf.mxu3  ;;  %v515_v18 = vadd.f32 %v514_v9, %v501_v13  ;;  %v489_v19 = vadd.f32 %v994_v10, %v488_v14 }
  0xa9   :  { %v529_v20 = vadd.f32 %v528_v17, %v515_v18  ;;  %v503_v21 = vadd.f32 %v502_v15, %v489_v19 }
  0xae   :  { %v516_v16 = vpop.f32.mrf.mxu2 }
  0xaf   :  { %v517_v26 = vadd.f32 %v516_v16, %v503_v21  ;;  %v530_v28 = vpop.f32.mrf.mxu3 }
  0xb1   :  { %v531_v30 = vadd.f32 %v530_v28, %v517_v26 }
  0xb6   :  { %v570_v25 = vpop.f32.mrf.mxu2 }
  0xbe   :  { %v542_v22 = vpop.f32.mrf.mxu0  ;;  %v572_v36 = vpop.f32.mrf.mxu2 }
  0xbf   :  { %v556_v23 = vpop.f32.mrf.mxu1  ;;  %v543_v24 = vadd.f32 %v542_v22, %v529_v20 }
  0xc1   :  { %v557_v27 = vadd.f32 %v556_v23, %v543_v24 }
  0xc3   :  { %v571_v29 = vadd.f32 %v570_v25, %v557_v27 }
  0xc5   :  { %v575_v31 = vmax.f32 %v571_v29, 0.0 }
  0xc6   :  { %v544_v32 = vpop.f32.mrf.mxu0 }
  0xc7   :  { %v545_v33 = vadd.f32 %v544_v32, %v531_v30  ;;  %929 = vmatmul.msk.f32.vlgmr.msrb.gmra.mxu3 %vm582_vm1, %v575_v31  ;;  %v558_v34 = vpop.f32.mrf.mxu1 }
  0xc9   :  { %v559_v35 = vadd.f32 %v558_v34, %v545_v33 }
  0xcb   :  { %v573_v37 = vadd.f32 %v572_v36, %v559_v35 }
  0xcd   :  { %v576_v38 = vmax.f32 %v573_v37, 0.0 }
  0xcf   :  { %930 = vmatmul.msk.f32.gmra.mxu3 %vm582_vm1, %v576_v38 }
 0x14a   :  { %v606_v41 = vpop.f32.mrf.mxu3 }
 0x14b   :  { %v607_v42 = vadd.f32 %v995_v40, %v606_v41 }
 0x14d   :  { %v612_v43 = vmax.f32 %v607_v42, 0.0 }
 0x14f   :  { %931 = vmatmul.msk.f32.vlgmr.msra.gmra.mxu2 %vm582_vm1, %v612_v43 }
 0x152   :  { %v609_v44 = vpop.f32.mrf.mxu3 }
 0x153   :  { %v610_v45 = vadd.f32 %v995_v40, %v609_v44 }
 0x155   :  { %v613_v46 = vmax.f32 %v610_v45, 0.0 }
 0x157   :  { %932 = vmatmul.msk.f32.gmra.mxu2 %vm582_vm1, %v613_v46 }
 0x1d2   :  { %v642_v48 = vpop.f32.mrf.mxu2 }
 0x1d3   :  { %v643_v49 = vadd.f32 %v996_v47, %v642_v48 }
 0x1d5   :  { %v648_v50 = vmax.f32 %v643_v49, 0.0 }
 0x1d7   :  { %933 = vmatmul.msk.f32.vlgmr.msra.gmra.mxu3 %vm582_vm1, %v648_v50 }
 0x1da   :  { %v645_v51 = vpop.f32.mrf.mxu2 }
 0x1db   :  { %v646_v52 = vadd.f32 %v996_v47, %v645_v51 }
 0x1dd   :  { %v649_v53 = vmax.f32 %v646_v52, 0.0 }
 0x1df   :  { %934 = vmatmul.msk.f32.gmra.mxu3 %vm582_vm1, %v649_v53 }
 0x25a   :  { %v678_v55 = vpop.f32.mrf.mxu3 }
 0x25b   :  { %v679_v56 = vadd.f32 %v997_v54, %v678_v55 }
 0x25d   :  { %684 = vst [vmem:[#allocation2] sm:$0xff] %v679_v56 }
 0x262   :  { %v681_v57 = vpop.f32.mrf.mxu3 }
 0x263   :  { %v682_v58 = vadd.f32 %v997_v54, %v681_v57 }
 0x265   :  { %685 = vst [vmem:[#allocation2 + $0x8] sm:$0xff] %v682_v58 }
 0x266   :  { %698 = dma.vmem_to_hbm [thread:$0]  %s691_s17, 256, %s693_s19, [#allocation3], %s1025_s20, %s1025_s20, %s1026_s21  }
 0x267   :  { %1022 = dma.done.wait [#allocation3], 256  }
 0x268   :  { %1023 = vsyncadd [#allocation3], 4294967040 }
 0x269   :  { %703 = vsyncpa [#allocation3], 1 }

</bundles_post_ra>
